<compile_context>
chip_gen: v6e
topology: v6e:2x2x1
jax: 0.10.0
libtpu: 0.0.40
codegen_flags: <defaults>
</compile_context>

<pallas_src>
import functools

import jax
import jax.numpy as jnp
from jax.experimental import pallas as pl
from jax.experimental.pallas import tpu as pltpu


def _vmem_limit_bytes():
    # Generation-aware: ~75% of physical per-core VMEM
    # (v7x: 64 MiB -> 48 MiB; v5e/v6e: 128 MiB -> 96 MiB).  Safe fallback.
    cap = 64 * 1024 * 1024
    try:
        info = pltpu.get_tpu_info()
        cap = int(getattr(info, "vmem_capacity_bytes", cap))
    except Exception:
        pass
    return max(32 * 1024 * 1024, min((cap * 3) // 4, 112 * 1024 * 1024))


VMEM_LIMIT_BYTES = _vmem_limit_bytes()


# ----------------------------------------------------------------------------
# Helpers
# ----------------------------------------------------------------------------

def _layernorm(x, gamma, beta, eps):
    # stats in f32 (x is f32 here)
    mu = jnp.mean(x, axis=-1, keepdims=True)
    xc = x - mu
    var = jnp.mean(xc * xc, axis=-1, keepdims=True)
    return xc * jax.lax.rsqrt(var + eps) * gamma + beta


def _pick_q_tile(S):
    # Cap at 128: keeps the per-tile f32 temporaries small (v5e has a single
    # vector-store slot); the MLP hidden is staged through VMEM so going to
    # 256 on v6e/v7x buys little.
    for cand in (128, 64, 32, 16, 8):
        if cand <= S and S % cand == 0:
            return cand
    return S


def _const_spec(shape):
    """Grid-invariant (weight/bias) BlockSpec, single-buffered if supported."""
    n = len(shape)
    idx = lambda b, qt: (0,) * n
    if hasattr(pl, "Buffered"):
        try:
            return pl.BlockSpec(shape, idx, pipeline_mode=pl.Buffered(1))
        except TypeError:
            pass
    return pl.BlockSpec(shape, idx)


# ----------------------------------------------------------------------------
# Kernel 1: embeddings sum + LayerNorm
# ----------------------------------------------------------------------------

def embed_ln_kernel(tok_ref, pos_ref, typ_ref, g_ref, b_ref, out_ref, *, eps):
    # tok: (S, H) bf16 for current batch; pos: (S, H) bf16; typ: (1, H) bf16.
    x = (tok_ref[...].astype(jnp.float32)
         + pos_ref[...].astype(jnp.float32)
         + typ_ref[...].astype(jnp.float32))
    out_ref[...] = _layernorm(x, g_ref[...], b_ref[...], eps)


def embed_layernorm(tok_emb, pos_emb, typ_row, gamma, beta, *, eps):
    B, S, H = tok_emb.shape
    return pl.pallas_call(
        functools.partial(embed_ln_kernel, eps=eps),
        out_shape=jax.ShapeDtypeStruct((B, S, H), jnp.float32),
        grid=(B,),
        in_specs=[pl.BlockSpec((None, S, H), lambda b: (b, 0, 0)),
                  pl.BlockSpec((S, H), lambda b: (0, 0)),
                  pl.BlockSpec((1, H), lambda b: (0, 0)),
                  pl.BlockSpec((1, H), lambda b: (0, 0)),
                  pl.BlockSpec((1, H), lambda b: (0, 0))],
        out_specs=pl.BlockSpec((None, S, H), lambda b: (b, 0, 0)),
        compiler_params=pltpu.CompilerParams(
            dimension_semantics=("parallel",),
            vmem_limit_bytes=VMEM_LIMIT_BYTES),
    )(tok_emb, pos_emb, typ_row, gamma, beta)


# ----------------------------------------------------------------------------
# Kernel 2: one full BERT layer (attention + MLP), q-tiled
# ----------------------------------------------------------------------------

def bert_layer_kernel(x_ref, wq_ref, bq_ref, wkv_ref, bkv_ref, wo_ref, bo_ref,
                      g1_ref, b1_ref, w_in_ref, b_in_ref, w_out_ref, b_out_ref,
                      g2_ref, b2_ref, out_ref,
                      k_scr, v_scr, z_scr, h_scr, *, num_heads, tq, eps):
    S, H = x_ref.shape
    hs = H // num_heads
    scale = 1.0 / (hs ** 0.5)
    qt = pl.program_id(1)

    # --- K/V projection once per batch element (qt == 0), head-major bf16 ---
    # TODO(synk): on v7x this projection could be its own pallas_call so the
    # q-tile axis can be marked "parallel" (2 TCs) even at B=1.
    @pl.when(qt == 0)
    def _project_kv():
        x_all = x_ref[...].astype(jnp.bfloat16)                       # (S, H)
        kv = jnp.dot(x_all, wkv_ref[...],
                     preferred_element_type=jnp.float32) + bkv_ref[...]
        kv = kv.astype(jnp.bfloat16)                                  # (S, 2H)
        # Head-major layout: the lane-offset column slices are paid once per
        # batch element; every per-head read below is a contiguous (S, hs)
        # tile via a cheap leading-axis index.
        for h in range(num_heads):                                    # static
            k_scr[h] = kv[:, h * hs:(h + 1) * hs]
            v_scr[h] = kv[:, H + h * hs:H + (h + 1) * hs]

    # --- current query tile ---------------------------------------------------
    r0 = pl.multiple_of(qt * tq, tq)
    x_rows = x_ref[pl.ds(r0, tq), :]                                  # (tq, H) f32
    # Q projected per tile: full K=H MXU contraction depth, no Q cache needed.
    q = jnp.dot(x_rows.astype(jnp.bfloat16), wq_ref[...],
                preferred_element_type=jnp.float32) + bq_ref[...]     # (tq, H)

    # --- multi-head attention; per-head context written into z_scr ------------
    # TODO(synk): on v6e/v7x, zero-padding hs to 128 (or 2-head batching over
    # the head-major scratch) would double MXU utilization of the score matmul.
    for h in range(num_heads):                                        # static
        qh = q[:, h * hs:(h + 1) * hs].astype(jnp.bfloat16)           # (tq, hs)
        kh = k_scr[h]                                                 # (S, hs) bf16
        vh = v_scr[h]                                                 # (S, hs) bf16
        s = jax.lax.dot_general(qh, kh, (((1,), (1,)), ((), ())),
                                preferred_element_type=jnp.float32) * scale
        # softmax over Kseq (no additive mask: one_zero_attention_mask is None)
        s = s - jnp.max(s, axis=-1, keepdims=True)
        p = jnp.exp(s)
        p = p * pl.reciprocal(jnp.sum(p, axis=-1, keepdims=True), approx=True)
        zh = jnp.dot(p.astype(jnp.bfloat16), vh,
                     preferred_element_type=jnp.float32)              # (tq, hs)
        z_scr[:, h * hs:(h + 1) * hs] = zh.astype(jnp.bfloat16)

    # --- ONE full-depth output projection + residual + LayerNorm 1 ------------
    attn = jnp.dot(z_scr[...], wo_ref[...],
                   preferred_element_type=jnp.float32) + bo_ref[...]
    ln1 = _layernorm(attn + x_rows, g1_ref[...], b1_ref[...], eps)

    # --- MLP (Linear -> GELU -> Linear) + residual + LayerNorm 2 ---------------
    hmid = jnp.dot(ln1.astype(jnp.bfloat16), w_in_ref[...],
                   preferred_element_type=jnp.float32) + b_in_ref[...]
    # Stage the GELU output through bf16 VMEM (it feeds a bf16 matmul anyway)
    # instead of holding a (tq, 4H) f32 value in vregs across the matmul.
    h_scr[...] = jax.nn.gelu(hmid, approximate=False).astype(jnp.bfloat16)
    m = jnp.dot(h_scr[...], w_out_ref[...],
                preferred_element_type=jnp.float32) + b_out_ref[...]
    out_ref[...] = _layernorm(m + ln1, g2_ref[...], b2_ref[...], eps)


def bert_layer(x, p, *, num_heads, eps):
    B, S, H = x.shape
    H4 = p["w_in"].shape[1]
    hs = H // num_heads
    tq = _pick_q_tile(S)
    n_qt = S // tq

    # rough advisory cost for the XLA scheduler (not a roofline model)
    flops = int(B * (24 * S * H * H + 4 * S * S * H))
    trans = int(B * (num_heads * S * S + S * H4))
    bytes_acc = int(12 * H * H * 2 + 2 * B * S * H * 4)

    return pl.pallas_call(
        functools.partial(bert_layer_kernel, num_heads=num_heads, tq=tq, eps=eps),
        out_shape=jax.ShapeDtypeStruct((B, S, H), jnp.float32),
        grid=(B, n_qt),
        in_specs=[pl.BlockSpec((None, S, H), lambda b, qt: (b, 0, 0)),  # x
                  _const_spec((H, H)), _const_spec((1, H)),             # W_Q, b_Q
                  _const_spec((H, 2 * H)), _const_spec((1, 2 * H)),     # W_KV, b_KV
                  _const_spec((H, H)), _const_spec((1, H)),             # W_O, b_O
                  _const_spec((1, H)), _const_spec((1, H)),             # ln1 g, b
                  _const_spec((H, H4)), _const_spec((1, H4)),           # W_in, b_in
                  _const_spec((H4, H)), _const_spec((1, H)),            # W_out, b_out
                  _const_spec((1, H)), _const_spec((1, H))],            # ln2 g, b
        out_specs=pl.BlockSpec((None, tq, H), lambda b, qt: (b, qt, 0)),
        scratch_shapes=[pltpu.VMEM((num_heads, S, hs), jnp.bfloat16),   # K head-major
                        pltpu.VMEM((num_heads, S, hs), jnp.bfloat16),   # V head-major
                        pltpu.VMEM((tq, H), jnp.bfloat16),              # per-head ctx
                        pltpu.VMEM((tq, H4), jnp.bfloat16)],            # gelu(mlp mid)
        compiler_params=pltpu.CompilerParams(
            dimension_semantics=("parallel", "arbitrary"),
            vmem_limit_bytes=VMEM_LIMIT_BYTES),
        cost_estimate=pl.CostEstimate(flops=flops, transcendentals=trans,
                                      bytes_accessed=bytes_acc),
    )(x, p["wq"], p["bq"], p["wkv"], p["bkv"], p["wo"], p["bo"],
      p["g1"], p["b1"], p["w_in"], p["b_in"], p["w_out"], p["b_out"],
      p["g2"], p["b2"])


# ----------------------------------------------------------------------------
# Parameter construction (deterministic, synthetic)
# ----------------------------------------------------------------------------

def init_params(key, *, vocab_size, max_seq_len, hidden, num_layers):
    ks = iter(jax.random.split(key, 4 + num_layers * 10))

    def nrm(shape, dtype=jnp.float32, scale=0.02):
        return (scale * jax.random.normal(next(ks), shape)).astype(dtype)

    bf16 = jnp.bfloat16
    params = {
        # embedding tables in bf16 (the embed kernel is HBM-bandwidth bound)
        "emb": nrm((vocab_size, hidden), bf16),
        "pos_emb": nrm((max_seq_len, hidden), bf16),
        "tkn_emb": nrm((2, hidden), bf16),
        "ln_g": jnp.ones((1, hidden), jnp.float32),
        "ln_b": jnp.zeros((1, hidden), jnp.float32),
        "blocks": [],
    }
    for _ in range(num_layers):
        blk = {
            "wq": nrm((hidden, hidden), bf16), "bq": nrm((1, hidden)),
            # fused K/V weight: columns [0:H]=K, [H:2H]=V
            "wkv": nrm((hidden, 2 * hidden), bf16), "bkv": nrm((1, 2 * hidden)),
            "wo": nrm((hidden, hidden), bf16), "bo": nrm((1, hidden)),
            "g1": jnp.ones((1, hidden), jnp.float32),
            "b1": jnp.zeros((1, hidden), jnp.float32),
            "w_in": nrm((hidden, 4 * hidden), bf16), "b_in": nrm((1, 4 * hidden)),
            "w_out": nrm((4 * hidden, hidden), bf16), "b_out": nrm((1, hidden)),
            "g2": jnp.ones((1, hidden), jnp.float32),
            "b2": jnp.zeros((1, hidden), jnp.float32),
        }
        params["blocks"].append(blk)
    return params


# ----------------------------------------------------------------------------
# Full BertCommon forward
# ----------------------------------------------------------------------------

def bert_common_forward(params, input_ids, *, num_heads, ln_eps=1e-5):
    # ln_eps matches nn.LayerNorm default (1e-5); pass the config's
    # layer_norm_epsilon here if it differs (e.g. HF BERT uses 1e-12).
    B, S = input_ids.shape
    H = params["emb"].shape[1]
    assert H % num_heads == 0

    # Embedding gathers (glue, plain JAX). token_type_ids defaults to zeros ->
    # a single (1, H) token-type-0 row is broadcast inside the kernel;
    # one_zero_attention_mask defaults to None (no additive mask).
    tok_emb = params["emb"][input_ids]                    # (B, S, H) bf16
    pos_emb = params["pos_emb"][:S]                       # (S, H) bf16
    typ_row = params["tkn_emb"][0:1]                      # (1, H) bf16

    out = embed_layernorm(tok_emb, pos_emb, typ_row,
                          params["ln_g"], params["ln_b"], eps=ln_eps)
    # dropout: identity in eval mode

    for blk in params["blocks"]:
        out = bert_layer(out, blk, num_heads=num_heads, eps=ln_eps)
    return out
    # TODO(synk): additive attention mask path (one_zero_attention_mask is not
    # None) is not implemented; the reference code's masked branch also
    # references an undefined variable. token_type_ids are assumed all-zero.


# ----------------------------------------------------------------------------

if __name__ == "__main__":
    VOCAB = 100
    MAX_SEQ = 16
    HIDDEN = 32
    NUM_HEADS = 4
    NUM_LAYERS = 2
    B, S = 2, 8

    key = jax.random.PRNGKey(0)
    k_param, k_ids = jax.random.split(key)
    params = init_params(k_param, vocab_size=VOCAB, max_seq_len=MAX_SEQ,
                         hidden=HIDDEN, num_layers=NUM_LAYERS)
    input_ids = jax.random.randint(k_ids, (B, S), 0, VOCAB, dtype=jnp.int32)

    out = bert_common_forward(params, input_ids, num_heads=NUM_HEADS)
    out = jax.block_until_ready(out)
    assert out.shape == (B, S, HIDDEN), out.shape
    assert jnp.all(jnp.isfinite(out))
    print("KERNEL_OK")
</pallas_src>

<mosaic_0001>
module attributes {stable_mosaic.version = 11 : i64} {
  func.func @embed_ln_kernel(%arg0: i32, %arg1: memref<1x8x32xbf16, #tpu.memory_space<vmem>>, %arg2: memref<8x32xbf16, #tpu.memory_space<vmem>>, %arg3: memref<1x32xbf16, #tpu.memory_space<vmem>>, %arg4: memref<1x32xf32, #tpu.memory_space<vmem>>, %arg5: memref<1x32xf32, #tpu.memory_space<vmem>>, %arg6: memref<1x8x32xf32, #tpu.memory_space<vmem>>) attributes {dimension_semantics = [#tpu.dimension_semantics<parallel>], iteration_bounds = array<i64: 2>, scalar_prefetch = 0 : i64, scratch_operands = 0 : i64, tpu.core_type = #tpu.core_type<tc>, window_params = [{transform_indices = @transform_0, window_bounds = array<i64: 1, 8, 32>}, {pipeline_mode = #tpu.pipeline_mode<synchronous>, transform_indices = @transform_1, window_bounds = array<i64: 8, 32>}, {pipeline_mode = #tpu.pipeline_mode<synchronous>, transform_indices = @transform_2, window_bounds = array<i64: 1, 32>}, {pipeline_mode = #tpu.pipeline_mode<synchronous>, transform_indices = @transform_3, window_bounds = array<i64: 1, 32>}, {pipeline_mode = #tpu.pipeline_mode<synchronous>, transform_indices = @transform_4, window_bounds = array<i64: 1, 32>}, {transform_indices = @transform_5, window_bounds = array<i64: 1, 8, 32>}]} {
    %c0 = arith.constant 0 : index
    %c0_0 = arith.constant 0 : index
    %c0_1 = arith.constant 0 : index
    %0 = vector.load %arg1[%c0, %c0_0, %c0_1] : memref<1x8x32xbf16, #tpu.memory_space<vmem>>, vector<1x8x32xbf16>
    %1 = vector.shape_cast %0 : vector<1x8x32xbf16> to vector<8x32xbf16>
    %2 = arith.extf %1 : vector<8x32xbf16> to vector<8x32xf32>
    %c0_2 = arith.constant 0 : index
    %c0_3 = arith.constant 0 : index
    %3 = vector.load %arg2[%c0_2, %c0_3] : memref<8x32xbf16, #tpu.memory_space<vmem>>, vector<8x32xbf16>
    %4 = arith.extf %3 : vector<8x32xbf16> to vector<8x32xf32>
    %5 = arith.addf %2, %4 : vector<8x32xf32>
    %c0_4 = arith.constant 0 : index
    %c0_5 = arith.constant 0 : index
    %6 = vector.load %arg3[%c0_4, %c0_5] : memref<1x32xbf16, #tpu.memory_space<vmem>>, vector<1x32xbf16>
    %7 = arith.extf %6 : vector<1x32xbf16> to vector<1x32xf32>
    %8 = vector.broadcast %7 : vector<1x32xf32> to vector<8x32xf32>
    %9 = arith.addf %5, %8 : vector<8x32xf32>
    %c0_6 = arith.constant 0 : index
    %c0_7 = arith.constant 0 : index
    %10 = vector.load %arg4[%c0_6, %c0_7] : memref<1x32xf32, #tpu.memory_space<vmem>>, vector<1x32xf32>
    %c0_8 = arith.constant 0 : index
    %c0_9 = arith.constant 0 : index
    %11 = vector.load %arg5[%c0_8, %c0_9] : memref<1x32xf32, #tpu.memory_space<vmem>>, vector<1x32xf32>
    %cst = arith.constant dense<0.000000e+00> : vector<8xf32>
    %12 = vector.multi_reduction <add>, %9, %cst [1] : vector<8x32xf32> to vector<8xf32>
    %13 = vector.shape_cast %12 : vector<8xf32> to vector<8x1xf32>
    %cst_10 = arith.constant 3.200000e+01 : f32
    %14 = vector.broadcast %cst_10 : f32 to vector<8x1xf32>
    %15 = arith.divf %13, %14 : vector<8x1xf32>
    %16 = vector.broadcast %15 : vector<8x1xf32> to vector<8x32xf32>
    %17 = arith.subf %9, %16 : vector<8x32xf32>
    %18 = arith.mulf %17, %17 : vector<8x32xf32>
    %cst_11 = arith.constant dense<0.000000e+00> : vector<8xf32>
    %19 = vector.multi_reduction <add>, %18, %cst_11 [1] : vector<8x32xf32> to vector<8xf32>
    %20 = vector.shape_cast %19 : vector<8xf32> to vector<8x1xf32>
    %cst_12 = arith.constant 3.200000e+01 : f32
    %21 = vector.broadcast %cst_12 : f32 to vector<8x1xf32>
    %22 = arith.divf %20, %21 : vector<8x1xf32>
    %cst_13 = arith.constant 9.99999974E-6 : f32
    %23 = vector.broadcast %cst_13 : f32 to vector<8x1xf32>
    %24 = arith.addf %22, %23 : vector<8x1xf32>
    %25 = math.rsqrt %24 : vector<8x1xf32>
    %26 = vector.broadcast %25 : vector<8x1xf32> to vector<8x32xf32>
    %27 = arith.mulf %17, %26 : vector<8x32xf32>
    %28 = vector.broadcast %10 : vector<1x32xf32> to vector<8x32xf32>
    %29 = arith.mulf %27, %28 : vector<8x32xf32>
    %30 = vector.broadcast %11 : vector<1x32xf32> to vector<8x32xf32>
    %31 = arith.addf %29, %30 : vector<8x32xf32>
    %c0_14 = arith.constant 0 : index
    %c0_15 = arith.constant 0 : index
    %c0_16 = arith.constant 0 : index
    %32 = vector.load %arg6[%c0_14, %c0_15, %c0_16] : memref<1x8x32xf32, #tpu.memory_space<vmem>>, vector<1x8x32xf32>
    %33 = vector.shape_cast %32 : vector<1x8x32xf32> to vector<8x32xf32>
    %34 = vector.shape_cast %31 : vector<8x32xf32> to vector<1x8x32xf32>
    tpu.vector_store %arg6[%c0_14, %c0_15, %c0_16], %34 {strides = array<i32>} : memref<1x8x32xf32, #tpu.memory_space<vmem>>, vector<1x8x32xf32>,
    return
  }
  func.func @transform_0(%arg0: i32) -> (i32, i32, i32) {
    %c0_i32 = arith.constant 0 : i32
    %c0_i32_0 = arith.constant 0 : i32
    %c0_i32_1 = arith.constant 0 : i32
    return %arg0, %c0_i32, %c0_i32_0 : i32, i32, i32
  }
  func.func @transform_1(%arg0: i32) -> (i32, i32) {
    %c0_i32 = arith.constant 0 : i32
    %c0_i32_0 = arith.constant 0 : i32
    %c0_i32_1 = arith.constant 0 : i32
    return %c0_i32, %c0_i32_0 : i32, i32
  }
  func.func @transform_2(%arg0: i32) -> (i32, i32) {
    %c0_i32 = arith.constant 0 : i32
    %c0_i32_0 = arith.constant 0 : i32
    %c0_i32_1 = arith.constant 0 : i32
    return %c0_i32, %c0_i32_0 : i32, i32
  }
  func.func @transform_3(%arg0: i32) -> (i32, i32) {
    %c0_i32 = arith.constant 0 : i32
    %c0_i32_0 = arith.constant 0 : i32
    %c0_i32_1 = arith.constant 0 : i32
    return %c0_i32, %c0_i32_0 : i32, i32
  }
  func.func @transform_4(%arg0: i32) -> (i32, i32) {
    %c0_i32 = arith.constant 0 : i32
    %c0_i32_0 = arith.constant 0 : i32
    %c0_i32_1 = arith.constant 0 : i32
    return %c0_i32, %c0_i32_0 : i32, i32
  }
  func.func @transform_5(%arg0: i32) -> (i32, i32, i32) {
    %c0_i32 = arith.constant 0 : i32
    %c0_i32_0 = arith.constant 0 : i32
    %c0_i32_1 = arith.constant 0 : i32
    return %arg0, %c0_i32, %c0_i32_0 : i32, i32, i32
  }
}

</mosaic_0001>

<bundles_post_ra>
// kernel: tpu_custom_call.1
= control target key start
LH: loop header
LB: loop body
LE: loop exit
PB: predicated region body
PF: predicated region fallthrough
CT: control target
= control target key end

     0   :  { %10 = vsyncpa [#allocation3], 0  ;;  %s802_s0 = inlined_call_operand.hbm [shape: bf16[2,8,32], index: 0, kind: input, shape index: {}]   ;;  %s803_s1 = inlined_call_operand.hbm [shape: bf16[8,32], index: 1, kind: input, shape index: {}]   ;;  %s804_s2 = inlined_call_operand.vmem [shape: bf16[1,32], index: 2, kind: input, shape index: {}]   ;;  %s805_s3 = inlined_call_operand.vmem [shape: f32[1,32], index: 3, kind: input, shape index: {}]   ;;  %s806_s4 = inlined_call_operand.vmem [shape: f32[1,32], index: 4, kind: input, shape index: {}]   ;;  %s807_s5 = inlined_call_operand.hbm [shape: f32[2,8,32], index: 5, kind: output, shape index: {}]  }
   0x1   :  { %12 = vsyncpa [#allocation3 + $0x1], 0 }
   0x2   :  { %13 = vsyncpa [#allocation6], 0 }
   0x3   :  { %14 = vsyncpa [#allocation4], 0 }
   0x4   :  { %16 = vsyncpa [#allocation4 + $0x1], 0  ;;  %s623_s18 = smov 0   ;;  %s625_s19 = smov 0  }
   0x5   :  { %s627_s20 = smov 0   ;;  %s629_s21 = smov 0  }
   0x6 LB: > { %s644_s22 = sadd.s32 4294967295, %s588_s21   ;;  %s391_s23 = sadd.s32 4294967294, %s588_s21   ;;  %s588_s21 = sphi %s629_s21, %s830_s21   ;;  %s584_s20 = sphi %s627_s20, %s829_s20   ;;  %s580_s19 = sphi %s625_s19, %s828_s19   ;;  %s576_s18 = sphi %s623_s18, %s827_s18  }
   0x7   : > { %p42_p0 = scmp.ne.s32.totalorder %s580_s19, %s576_s18  ;;  %p808_p1 = scmp.eq.s32.totalorder %s644_s22, 0 }
   0x8   : > { %p156_p3 = scmp.eq.s32.totalorder %s391_s23, 1  ;;  %p392_p5 = scmp.ge.s32.totalorder %s588_s21, 1 }
   0x9   : > { %p653_p4 = por %p808_p1, %p42_p0  ;;  %p163_p7 = scmp.lt.s32.totalorder %s588_s21, 3 }
   0xa   : > { %p658_p6 = por %p156_p3, %p42_p0  ;;  %s590_s27 = smov [#allocation5]  }
   0xb   : > { %s812_s24 = scalar_select %p653_p4, 1, 0 }
   0xc   : > { %s813_s25 = scalar_select %p658_p6, 1, 0 }
   0xd   : > { %p663_p8 = pnand %p392_p5, %p163_p7  ;;  %s176_s28 = sshll.u32 %s590_s27, 4  ;;  %s177_s28 = int_to_ptr.vmem [resolvable:$true] %s176_s28 }
   0xe   : > { %s671_s29 = sadd.s32 1, %s588_s21   ;;  %s29_s8 = sadd.s32 1, %s584_s20 }
   0xf   : > { %s814_s26 = scalar_select %p663_p8, 1, 0 }
  0x10   : > { %p415_p10 = pneg %p663_p8  ;;  %s26_s6 = ssub.s32 %s588_s21, %s671_s29 }
  0x11   : > { %p681_p12 = scmp.eq.s32.totalorder %s26_s6, 0  ;;  %p36_p13 = scmp.ne.s32.totalorder %s584_s20, %s580_s19 }
  0x12   : > { %p675_p11 = pnand %p415_p10, %p808_p1  ;;  %s477_s9 = scalar_lea.vmem %s177_s28, 64 }
  0x13   : > { %p478_p3 = scmp.ne.s32.totalorder %s177_s28, %s477_s9  ;;  %p485_p9 = scmp.lt.s32.totalorder %s177_s28, %s177_s28 }
  0x14   : > { %p468_p0 = pneg %p675_p11  ;;  %p486_p2 = scmp.lt.s32.totalorder %s477_s9, %s477_s9 }
  0x16   : > { %p480_p5 = pnand %p478_p3, %p468_p0  ;;  %p487_p10 = por %p486_p2, %p485_p9 }
  0x18   : > { %p481_p7 = pneg %p480_p5 }
  0x1a   : > { %p488_p1 = pnand %p487_p10, %p481_p7 }
  0x1c   : > { %491 = shalt.err (!%p488_p1)
}
  0x1d   : > { %418 = dma.hbm_to_vmem [thread:$0]  (!%p675_p11), %s803_s1, 64, %s177_s28, [#allocation6]  }
  0x1e   : > { %s698_s12 = scalar_select %p681_p12, %s584_s20, %s29_s8  }
  0x1f   : > { %p37_p1 = scmp.eq.s32.totalorder %s588_s21, 0  ;;  %p817_p2 = scmp.eq.s32.totalorder %s644_s22, 1 }
  0x20   : > { %p428_p0 = scmp.lt.s32.totalorder %s588_s21, 2  ;;  %s196_s14 = sand.u32 1, %s584_s20  }
  0x21   : > { %p706_p9 = por %p817_p2, %p36_p13  ;;  %p38_p3 = por %p37_p1, %p36_p13 }
  0x22   : > { %s395_s15 = sshll.u32 %s196_s14, 2  ;;  %s396_s16 = sshll.u32 %s588_s21, 6 }
  0x23   : > { %s818_s13 = scalar_select %p706_p9, 1, 0 }
  0x24   : > { %s719_s27 = scalar_lea.hbm %s802_s0, %s396_s16  ;;  %s200_s28 = scalar_lea.vmem [#allocation2], %s395_s15 }
  0x25   : > { %s207_s30 = sshll.u32 %s200_s28, 4  ;;  %p721_p11 = pnand %p428_p0, %p38_p3  ;;  %s208_s30 = int_to_ptr.vmem [resolvable:$true] %s207_s30 }
  0x26   : > { %s197_s7 = scalar_lea.sflag [#allocation3], %s196_s14  ;;  %s492_s8 = scalar_lea.hbm %s719_s27, 64 }
  0x27   : > { %p493_p12 = scmp.ne.s32.totalorder %s719_s27, %s492_s8  ;;  %p494_p13 = pneg %p721_p11 }
  0x28   : > { %s497_s11 = scalar_lea.hbm %s802_s0, 128  ;;  %p498_p10 = scmp.lt.s32.totalorder %s719_s27, %s802_s0 }
  0x29   : > { %p495_p5 = pnand %p494_p13, %p493_p12  ;;  %p499_p1 = scmp.lt.s32.totalorder %s497_s11, %s492_s8 }
  0x2b   : > { %p496_p7 = pneg %p495_p5  ;;  %p500_p2 = por %p499_p1, %p498_p10 }
  0x2d   : > { %p501_p0 = pnand %p500_p2, %p496_p7 }
  0x2f   : > { %504 = shalt.err (!%p501_p0)
}
  0x30   : > { %s505_s17 = scalar_lea.vmem %s208_s30, 64  ;;  %s591_s14 = smov [#allocation2]  }
  0x31   : > { %p506_p3 = scmp.ne.s32.totalorder %s208_s30, %s505_s17  ;;  %s510_s23 = sshll.u32 %s591_s14, 4  ;;  %s511_s23 = int_to_ptr.vmem [resolvable:$false] %s510_s23 }
  0x32   : > { %s512_s28 = scalar_lea.vmem %s511_s23, 128  ;;  %p513_p12 = scmp.lt.s32.totalorder %s208_s30, %s511_s23 }
  0x33   : > { %p508_p6 = pnand %p506_p3, %p494_p13  ;;  %p514_p5 = scmp.lt.s32.totalorder %s512_s28, %s505_s17 }
  0x35   : > { %p509_p9 = pneg %p508_p6  ;;  %p515_p4 = por %p514_p5, %p513_p12 }
  0x37   : > { %p516_p8 = pnand %p515_p4, %p509_p9 }
  0x39   : > { %519 = shalt.err (!%p516_p8)
}
  0x3a   : > { %422 = dma.hbm_to_vmem [thread:$0]  (!%p721_p11), %s719_s27, 64, %s208_s30, %s197_s7  }
  0x3b   : > { %p820_p7 = scmp.ne.s32.totalorder %s814_s26, 0 }
  0x3c   : > { %s742_s8 = sand.u32 (!%p820_p7), 1, %s580_s19   ;;  %p821_p6 = scmp.ne.s32.totalorder (!%p820_p7), %s812_s24, 0 }
  0x3d   : > { %216 = sbr.rel (%p820_p7) target bundleno = 401 (0x191), region = 40  ;;  %s398_s9 = sshll.u32 (!%p820_p7), %s742_s8, 2 }
  0x3e   : > { %s219_s10 = scalar_lea.sflag (!%p820_p7), [#allocation3], %s742_s8  ;;  %s222_s11 = scalar_lea.vmem (!%p820_p7), [#allocation2], %s398_s9 }
  0x42   : > { %563 = dma.done.wait (%p821_p6), %s219_s10, 64  }
  0x43   : > { %565 = vsyncadd (%p821_p6), %s219_s10, 4294967232  ;;  %p822_p4 = scmp.eq.s32.totalorder %s644_s22, 0 }
  0x45   : > { %567 = dma.done.wait (%p822_p4), [#allocation6], 64   ;;  %p823_p8 = pmov %p822_p4 }
  0x46   : > { %v260_v0 = vlaneseq  ;;  %v253_v3 = vld [vmem:[%s222_s11] sm:$0xf]  ;;  %v255_v4 = vld [vmem:[#allocation5] sm:$0xf]  ;;  %vm267_vm0 = vcmask 261120   ;;  %s400_s24 = sshll.u32 %s742_s8, 3 }
  0x47   : > { %569 = vsyncadd (%p823_p8), [#allocation6], 4294967232  ;;  %v258_v5 = vld [vmem:[%s804_s2] sm:$0x1]  ;;  %v254_v6 = vunpack.c.l.bf16 %v253_v3  ;;  %v256_v7 = vunpack.c.l.bf16 %v255_v4  ;;  %s404_s15 = sshll.u32 %s644_s22, 7  ;;  %s252_s17 = scalar_lea.vmem [#allocation7], %s400_s24 }
  0x48   : > { %v261_v1 = vshrl.u32 %v260_v0, 7  ;;  %v259_v8 = vunpack.c.l.bf16 %v258_v5  ;;  %v401_v22 = vld [vmem:[%s805_s3] ss:$0 sm:$0xff]  ;;  %s311_s14 = sshll.u32 %s252_s17, 4  ;;  %s309_s9 = scalar_lea.hbm %s807_s5, %s404_s15  ;;  %s312_s14 = int_to_ptr.vmem [resolvable:$true] %s311_s14 }
  0x49   : > { %v257_v9 = vadd.f32 %v256_v7, %v254_v6  ;;  %v402_v24 = vld [vmem:[%s806_s4] ss:$0 sm:$0xff]  ;;  %s298_s10 = scalar_lea.sflag [#allocation4], %s742_s8  ;;  %s520_s11 = scalar_lea.vmem %s312_s14, 128 }
  0x4a   : > { %v262_v2 = vsub.s32 0, %v261_v1  ;;  %p521_p9 = scmp.ne.s32.totalorder %s312_s14, %s520_s11  ;;  %p824_p11 = scmp.ne.s32.totalorder %s818_s13, 0 }
  0x4b   : > { %s592_s26 = smov [#allocation7]  }
  0x4c   : > { %v263_v10 = vrot.slane %v259_v8, %v262_v2  ;;  %p522_p13 = pnand %p521_p9, %p824_p11  ;;  %s524_s27 = sshll.u32 %s592_s26, 4  ;;  %s525_s27 = int_to_ptr.vmem [resolvable:$false] %s524_s27 }
  0x4d   : > { %s526_s22 = scalar_lea.vmem %s525_s27, 256  ;;  %p527_p1 = scmp.lt.s32.totalorder %s312_s14, %s525_s27 }
  0x4e   : > { %v264_v11 = vadd.f32 %v263_v10, %v257_v9  ;;  %p523_p10 = pneg %p522_p13  ;;  %p528_p2 = scmp.lt.s32.totalorder %s526_s22, %s520_s11 }
  0x50   : > { %v268_v12 = vsel %vm267_vm0, %v264_v11, 0.0  ;;  %p529_p0 = por %p528_p2, %p527_p1 }
  0x51   : > { %269 = vadd.xlane.f32.xlu0 %v268_v12 }
  0x52   : > { %p530_p3 = pnand %p529_p0, %p523_p10 }
  0xda   : > { %v270_v13 = vpop.xlane.xlu0 %269 }
  0xdb   : > { %v272_v14 = vmul.f32 0.03125, %v270_v13 }
  0xdd   : > { %v273_v15 = vsub.f32 %v264_v11, %v272_v14 }
  0xdf   : > { %v274_v16 = vmul.f32 %v273_v15, %v273_v15 }
  0xe1   : > { %v275_v17 = vsel %vm267_vm0, %v274_v16, 0.0 }
  0xe2   : > { %276 = vadd.xlane.f32.xlu0 %v275_v17 }
 0x16b   : > { %v277_v18 = vpop.xlane.xlu0 %276 }
 0x16c   : > { %v278_v19 = vmul.f32 0.03125, %v277_v18 }
 0x16e   : > { %v279_v20 = vadd.f32 1e-05, %v278_v19 }
 0x170   : > { %464 = vrsqrt.f32 %v279_v20 }
 0x17d   : > { %v465_v21 = vpop.eup %464 }
 0x17e   : > { %v281_v23 = vmul.f32 %v465_v21, %v273_v15 }
 0x180   : > { %v288_v25 = vmul.f32 %v401_v22, %v281_v23 }
 0x182   : > { %v295_v26 = vadd.f32 %v402_v24, %v288_v25 }
 0x184   : > { %296 = vst.msk [vmem:[%s252_s17] sm:$0xff] %vm267_vm0, %v295_v26 }
 0x185   : > { %533 = shalt.err (!%p530_p3)
}
 0x186   : > { %s534_s24 = scalar_lea.hbm %s309_s9, 128  ;;  %s538_s6 = scalar_lea.hbm %s807_s5, 256 }
 0x187   : > { %p535_p12 = scmp.ne.s32.totalorder %s309_s9, %s534_s24  ;;  %p539_p6 = scmp.lt.s32.totalorder %s309_s9, %s807_s5 }
 0x188   : > { %p540_p4 = scmp.lt.s32.totalorder %s538_s6, %s534_s24 }
 0x189   : > { %p536_p5 = pnand %p535_p12, %p824_p11 }
 0x18a   : > { %p541_p8 = por %p540_p4, %p539_p6 }
 0x18b   : > { %p537_p7 = pneg %p536_p5 }
 0x18d   : > { %p542_p9 = pnand %p541_p8, %p537_p7 }
 0x18f   : > { %545 = shalt.err (!%p542_p9)
}
 0x190   : > { %413 = dma.vmem_to_hbm [thread:$0]  (%p824_p11), %s312_s14, 128, %s309_s9, %s298_s10  }
 0x191 PF: > { %s323_s15 = sand.u32 1, %s576_s18   ;;  %p825_p13 = scmp.ne.s32.totalorder %s813_s25, 0 }
 0x192   : > { %p826_p10 = scmp.ge.s32.totalorder %s588_s21, 2  ;;  %s324_s17 = scalar_lea.sflag [#allocation4], %s323_s15 }
 0x194   : > { %p424_p1 = pnand %p826_p10, %p825_p13 }
 0x196   : > { %p425_p2 = pneg %p424_p1 }
 0x198   : > { %571 = dma.done.wait (%p425_p2), %s324_s17, 128  }
 0x199   : > { %573 = vsyncadd (%p425_p2), %s324_s17, 4294967168  ;;  %p19_p0 = scmp.ge.s32.totalorder %s671_s29, 4   ;;  %s827_s18 = smov %s580_s19 }
 0x19a   : > { %s828_s19 = smov %s584_s20  ;;  %s829_s20 = smov %s698_s12 }
 0x19b   : > { %s830_s21 = smov %s671_s29  ;;  %21 = sbr.rel (!%p19_p0) target bundleno = 6 (0x6), region = 89 }
 0x1a0   :  { %329 = vsyncpa [#allocation3], 1 }
 0x1a1   :  { %331 = vsyncpa [#allocation3 + $0x1], 1 }
 0x1a2   :  { %332 = vsyncpa [#allocation6], 1 }
 0x1a3   :  { %333 = vsyncpa [#allocation4], 1 }
 0x1a4   :  { %335 = vsyncpa [#allocation4 + $0x1], 1 }

</bundles_post_ra>
